<compile_context>
chip_gen: v6e
topology: v6e:2x2x1
jax: 0.10.0
libtpu: 0.0.40
codegen_flags: <defaults>
</compile_context>

<pallas_src>
import functools

import jax
import jax.numpy as jnp
from jax import lax
from jax.experimental import pallas as pl
from jax.experimental.pallas import tpu as pltpu

EPS = 1e-5              # nn.BatchNorm1d default eps
K = 5                   # conv5x1 kernel size
PAD = 2                 # conv5x1 padding
LANE = 128              # TPU lane width
VMEM_BUDGET = 48 << 20  # per-core working-set target (headroom under v7x's 64 MiB VMEM)


def _pick_cout_tile(cout, per_row_bytes, fixed_bytes, budget):
    """Largest multiple-of-8 divisor of Cout that (a) fits the VMEM budget, (b) is <= 128
    (v5e MXU width), and (c) leaves >= 2 grid steps when possible (v7x megacore / DMA overlap)."""
    cands = [t for t in (128, 64, 32, 16, 8) if t <= cout and cout % t == 0]
    if not cands:
        return cout                      # full-array block: sublane rule waived, grid = 1
    fits = [t for t in cands if fixed_bytes + t * per_row_bytes <= budget] or [cands[-1]]
    multi = [t for t in fits if cout // t >= 2]
    return max(multi) if multi else max(fits)


def _score_block_kernel(x_ref, w_ref, g_ref, b_ref, m_ref, o_ref, conv_ref, *,
                        n_batch, l_out, l_out_pad, stride):
    """One Cout tile: conv (K shifted MXU matmuls, f32 acc) + BN (batch stats) + sigmoid.

    x_ref:    (stride*N, Cin, Lq_pad)  phase-split padded input (shared across grid steps)
    w_ref:    (K, Tc, Cin)             conv weights for this channel tile
    g_ref:    (Tc, 1)                  BN gamma
    b_ref:    (Tc, 1)                  BN beta
    m_ref:    (1, N*Lout_pad)          1.0 on valid columns, 0.0 on lane-padding columns
    o_ref:    (Tc, N*Lout_pad)         lane-dense output tile
    conv_ref: (Tc, N*Lout_pad)         f32 conv scratch (read twice: stats, then normalize)
    """
    k_taps, tc, _ = w_ref.shape
    n_phases = min(stride, k_taps)

    def conv_one_sample(n, carry):
        # One (Cin, Lq_pad) row load per phase; all K taps are unit-stride slices of it,
        # so no patch matrix is ever materialized (and nothing is rebuilt per grid step).
        rows = [x_ref[p * n_batch + n] for p in range(n_phases)]
        acc = jnp.zeros((tc, l_out_pad), jnp.float32)
        for k in range(k_taps):                                   # static 5-tap loop
            phase, off = k % stride, k // stride
            tap = rows[phase][:, off:off + l_out_pad]             # (Cin, Lout_pad)
            acc = acc + jnp.dot(w_ref[k], tap,
                                preferred_element_type=jnp.float32)
        col0 = pl.multiple_of(n * l_out_pad, LANE)                # 128-aligned, unmasked stores
        conv_ref[:, pl.ds(col0, l_out_pad)] = acc
        return carry

    lax.fori_loop(0, n_batch, conv_one_sample, 0, unroll=True)

    # BatchNorm1d (training mode): per-channel stats over the valid (N, Lout) columns only,
    # two-pass (centered) variance to avoid E[x^2]-E[x]^2 cancellation; biased var, eps=1e-5.
    conv = conv_ref[...]                                          # (Tc, N*Lout_pad) f32
    mask = m_ref[...]                                             # (1,  N*Lout_pad) f32
    inv_n = 1.0 / (n_batch * l_out)
    mean = jnp.sum(conv * mask, axis=1, keepdims=True) * inv_n
    cen = (conv - mean) * mask
    var = jnp.sum(cen * cen, axis=1, keepdims=True) * inv_n
    scale = g_ref[...] * lax.rsqrt(var + EPS)                     # EUP slot
    bias = b_ref[...] - mean * scale
    o_ref[...] = jax.nn.sigmoid(conv * scale + bias).astype(o_ref.dtype)


def score_block_forward(x, weight, gamma, beta, *, stride=1):
    """x: (N, Cin, L); weight: (Cout, Cin, 5); gamma/beta: (Cout,). Returns (N, Cout, Lout)."""
    N, Cin, L = x.shape
    Cout, Cin_w, Kw = weight.shape
    assert Kw == K and Cin_w == Cin
    lp = L + 2 * PAD
    lout = (lp - K) // stride + 1
    lout_pad = pl.cdiv(lout, LANE) * LANE        # per-sample lane padding -> unmasked stores
    off_max = (K - 1) // stride
    lq_pad = max(-(-lp // stride), off_max + lout_pad)
    nlp = N * lout_pad

    # --- wrapper glue: layout plumbing only, no K-fold im2col inflation in HBM ---
    # pad, then split the length axis into `stride` phases so every conv tap is a contiguous
    # unit-stride slice in-kernel:  x_ph[p*N + n, ci, j] == x_pad[n, ci, j*stride + p]
    x_pad = jnp.pad(x, ((0, 0), (0, 0), (PAD, PAD + lq_pad * stride - lp)))
    x_ph = (x_pad.reshape(N, Cin, lq_pad, stride)
                 .transpose(3, 0, 1, 2)
                 .reshape(stride * N, Cin, lq_pad))
    w3 = weight.transpose(2, 0, 1).astype(x.dtype)   # (K, Cout, Cin); MXU operands same dtype
    g2 = gamma.reshape(Cout, 1).astype(jnp.float32)
    b2 = beta.reshape(Cout, 1).astype(jnp.float32)
    mask = jnp.tile(jnp.arange(lout_pad) < lout, N).reshape(1, nlp).astype(jnp.float32)

    # --- VMEM-budgeted Cout tiling + explicit scoped-VMEM limit ---
    itemsize = x.dtype.itemsize
    fixed = 2 * x_ph.size * itemsize                              # shared input (double-buffered)
    per_row = nlp * (4 + 2 * itemsize) + 2 * K * Cin * itemsize + 16
    tc = _pick_cout_tile(Cout, per_row, fixed, VMEM_BUDGET)
    grid = (pl.cdiv(Cout, tc),)
    need = fixed + 2 * nlp * 4 + tc * per_row + 4 * tc * nlp * 4  # + elementwise temporaries
    vmem_limit = int(min(max(2 * need, 16 << 20), 56 << 20))

    kernel = functools.partial(_score_block_kernel, n_batch=N, l_out=lout,
                               l_out_pad=lout_pad, stride=stride)

    cost = pl.CostEstimate(
        flops=2 * Cout * K * Cin * N * lout + 8 * Cout * N * lout,
        transcendentals=2 * Cout * N * lout,                      # sigmoid: exp + reciprocal
        bytes_accessed=(x_ph.size + w3.size + Cout * nlp) * itemsize
                       + (g2.size + b2.size + mask.size) * 4,
    )

    out2d = pl.pallas_call(
        kernel,
        out_shape=jax.ShapeDtypeStruct((Cout, nlp), x.dtype),
        grid_spec=pltpu.PrefetchScalarGridSpec(
            num_scalar_prefetch=0,
            grid=grid,
            in_specs=[
                pl.BlockSpec((stride * N, Cin, lq_pad), lambda i: (0, 0, 0)),  # shared input
                pl.BlockSpec((K, tc, Cin), lambda i: (0, i, 0)),               # weight tile
                pl.BlockSpec((tc, 1), lambda i: (i, 0)),                       # gamma tile
                pl.BlockSpec((tc, 1), lambda i: (i, 0)),                       # beta tile
                pl.BlockSpec((1, nlp), lambda i: (0, 0)),                      # valid-column mask
            ],
            out_specs=pl.BlockSpec((tc, nlp), lambda i: (i, 0)),               # lane-dense out
            scratch_shapes=[pltpu.VMEM((tc, nlp), jnp.float32)],               # f32 conv buffer
        ),
        compiler_params=pltpu.CompilerParams(
            # BN stats are per-channel, so the Cout split is exact and "parallel" is safe;
            # the tile pick prefers >= 2 grid steps so both v7x TensorCores get work.
            dimension_semantics=("parallel",),
            vmem_limit_bytes=vmem_limit,
        ),
        cost_estimate=cost,
    )(x_ph, w3, g2, b2, mask)

    # drop lane padding and restore the PyTorch NCL layout (wrapper-side plumbing)
    return out2d.reshape(Cout, N, lout_pad)[:, :, :lout].transpose(1, 0, 2)


def score_block_reference(x, weight, gamma, beta, *, stride=1):
    conv = lax.conv_general_dilated(
        x, weight, window_strides=(stride,), padding=[(PAD, PAD)],
        dimension_numbers=('NCH', 'OIH', 'NCH'))
    mean = conv.mean(axis=(0, 2), keepdims=True)
    var = ((conv - mean) ** 2).mean(axis=(0, 2), keepdims=True)
    y = (conv - mean) / jnp.sqrt(var + EPS) * gamma.reshape(1, -1, 1) + beta.reshape(1, -1, 1)
    return jax.nn.sigmoid(y)


def _run_case(key, n, c_in, c_out, length, stride):
    kx, kw, kg, kb = jax.random.split(key, 4)
    x = jax.random.normal(kx, (n, c_in, length), dtype=jnp.float32)
    weight = 0.2 * jax.random.normal(kw, (c_out, c_in, K), dtype=jnp.float32)  # conv5x1, bias=False
    gamma = 1.0 + 0.1 * jax.random.normal(kg, (c_out,), dtype=jnp.float32)     # BN weight
    beta = 0.1 * jax.random.normal(kb, (c_out,), dtype=jnp.float32)            # BN bias
    # TODO(synk): BatchNorm running_mean/running_var updates are training-time state mutations
    # that do not affect the forward output; they are not modeled here.
    out = jax.block_until_ready(score_block_forward(x, weight, gamma, beta, stride=stride))
    ref = score_block_reference(x, weight, gamma, beta, stride=stride)
    assert out.shape == ref.shape, (out.shape, ref.shape)
    err = float(jnp.max(jnp.abs(out - ref)))
    assert jnp.allclose(out, ref, atol=2e-5, rtol=2e-5), err


if __name__ == "__main__":
    key = jax.random.PRNGKey(0)
    k1, k2 = jax.random.split(key)
    # ScoreBlock(inplane=4, midplane=8, stride=2): single Cout tile, strided conv
    _run_case(k1, n=2, c_in=4, c_out=8, length=16, stride=2)
    # ScoreBlock(inplane=4, midplane=16, stride=1): 2-step Cout grid ("parallel"), unit stride
    _run_case(k2, n=2, c_in=4, c_out=16, length=40, stride=1)
    print("KERNEL_OK")
</pallas_src>

<mosaic_0001>
module attributes {stable_mosaic.version = 11 : i64} {
  func.func @_score_block_kernel(%arg0: i32, %arg1: memref<4x4x130xf32, #tpu.memory_space<vmem>>, %arg2: memref<5x8x4xf32, #tpu.memory_space<vmem>>, %arg3: memref<8x1xf32, #tpu.memory_space<vmem>>, %arg4: memref<8x1xf32, #tpu.memory_space<vmem>>, %arg5: memref<1x256xf32, #tpu.memory_space<vmem>>, %arg6: memref<8x256xf32, #tpu.memory_space<vmem>>, %arg7: memref<8x256xf32, #tpu.memory_space<vmem>>) attributes {dimension_semantics = [#tpu.dimension_semantics<parallel>], iteration_bounds = array<i64: 1>, scalar_prefetch = 0 : i64, scratch_operands = 1 : i64, tpu.core_type = #tpu.core_type<tc>, window_params = [{pipeline_mode = #tpu.pipeline_mode<synchronous>, transform_indices = @transform_0, window_bounds = array<i64: 4, 4, 130>}, {transform_indices = @transform_1, window_bounds = array<i64: 5, 8, 4>}, {transform_indices = @transform_2, window_bounds = array<i64: 8, 1>}, {transform_indices = @transform_3, window_bounds = array<i64: 8, 1>}, {pipeline_mode = #tpu.pipeline_mode<synchronous>, transform_indices = @transform_4, window_bounds = array<i64: 1, 256>}, {transform_indices = @transform_5, window_bounds = array<i64: 8, 256>}]} {
    %c0_i32 = arith.constant 0 : i32
    %c0_i32_0 = arith.constant 0 : i32
    %0 = arith.addi %c0_i32_0, %c0_i32 : i32
    %1 = arith.index_cast %0 : i32 to index
    %c0 = arith.constant 0 : index
    %c0_1 = arith.constant 0 : index
    %2 = vector.load %arg1[%1, %c0, %c0_1] : memref<4x4x130xf32, #tpu.memory_space<vmem>>, vector<1x4x130xf32>
    %3 = vector.shape_cast %2 : vector<1x4x130xf32> to vector<4x130xf32>
    %c2_i32 = arith.constant 2 : i32
    %4 = arith.addi %c2_i32, %c0_i32 : i32
    %5 = arith.index_cast %4 : i32 to index
    %c0_2 = arith.constant 0 : index
    %c0_3 = arith.constant 0 : index
    %6 = vector.load %arg1[%5, %c0_2, %c0_3] : memref<4x4x130xf32, #tpu.memory_space<vmem>>, vector<1x4x130xf32>
    %7 = vector.shape_cast %6 : vector<1x4x130xf32> to vector<4x130xf32>
    %cst = arith.constant 0.000000e+00 : f32
    %8 = vector.broadcast %cst : f32 to vector<8x128xf32>
    %9 = vector.extract_strided_slice %3 {offsets = [0, 0], sizes = [4, 128], strides = [1, 1]} : vector<4x130xf32> to vector<4x128xf32>
    %c0_4 = arith.constant 0 : index
    %c0_5 = arith.constant 0 : index
    %c0_6 = arith.constant 0 : index
    %10 = vector.load %arg2[%c0_4, %c0_5, %c0_6] : memref<5x8x4xf32, #tpu.memory_space<vmem>>, vector<1x8x4xf32>
    %11 = vector.shape_cast %10 : vector<1x8x4xf32> to vector<8x4xf32>
    %cst_7 = arith.constant dense<0.000000e+00> : vector<8x128xf32>
    %12 = tpu.matmul %11, %9, %cst_7 {dimension_numbers = #tpu.dot_dimension_numbers<[1], [0], [0], [1], [0, 0, 1, 1], [], []>} : vector<8x4xf32>, vector<4x128xf32>, vector<8x128xf32> -> vector<8x128xf32>
    %13 = arith.addf %8, %12 : vector<8x128xf32>
    %14 = vector.extract_strided_slice %7 {offsets = [0, 0], sizes = [4, 128], strides = [1, 1]} : vector<4x130xf32> to vector<4x128xf32>
    %c1 = arith.constant 1 : index
    %c0_8 = arith.constant 0 : index
    %c0_9 = arith.constant 0 : index
    %15 = vector.load %arg2[%c1, %c0_8, %c0_9] : memref<5x8x4xf32, #tpu.memory_space<vmem>>, vector<1x8x4xf32>
    %16 = vector.shape_cast %15 : vector<1x8x4xf32> to vector<8x4xf32>
    %cst_10 = arith.constant dense<0.000000e+00> : vector<8x128xf32>
    %17 = tpu.matmul %16, %14, %cst_10 {dimension_numbers = #tpu.dot_dimension_numbers<[1], [0], [0], [1], [0, 0, 1, 1], [], []>} : vector<8x4xf32>, vector<4x128xf32>, vector<8x128xf32> -> vector<8x128xf32>
    %18 = arith.addf %13, %17 : vector<8x128xf32>
    %19 = vector.extract_strided_slice %3 {offsets = [0, 1], sizes = [4, 128], strides = [1, 1]} : vector<4x130xf32> to vector<4x128xf32>
    %c2 = arith.constant 2 : index
    %c0_11 = arith.constant 0 : index
    %c0_12 = arith.constant 0 : index
    %20 = vector.load %arg2[%c2, %c0_11, %c0_12] : memref<5x8x4xf32, #tpu.memory_space<vmem>>, vector<1x8x4xf32>
    %21 = vector.shape_cast %20 : vector<1x8x4xf32> to vector<8x4xf32>
    %cst_13 = arith.constant dense<0.000000e+00> : vector<8x128xf32>
    %22 = tpu.matmul %21, %19, %cst_13 {dimension_numbers = #tpu.dot_dimension_numbers<[1], [0], [0], [1], [0, 0, 1, 1], [], []>} : vector<8x4xf32>, vector<4x128xf32>, vector<8x128xf32> -> vector<8x128xf32>
    %23 = arith.addf %18, %22 : vector<8x128xf32>
    %24 = vector.extract_strided_slice %7 {offsets = [0, 1], sizes = [4, 128], strides = [1, 1]} : vector<4x130xf32> to vector<4x128xf32>
    %c3 = arith.constant 3 : index
    %c0_14 = arith.constant 0 : index
    %c0_15 = arith.constant 0 : index
    %25 = vector.load %arg2[%c3, %c0_14, %c0_15] : memref<5x8x4xf32, #tpu.memory_space<vmem>>, vector<1x8x4xf32>
    %26 = vector.shape_cast %25 : vector<1x8x4xf32> to vector<8x4xf32>
    %cst_16 = arith.constant dense<0.000000e+00> : vector<8x128xf32>
    %27 = tpu.matmul %26, %24, %cst_16 {dimension_numbers = #tpu.dot_dimension_numbers<[1], [0], [0], [1], [0, 0, 1, 1], [], []>} : vector<8x4xf32>, vector<4x128xf32>, vector<8x128xf32> -> vector<8x128xf32>
    %28 = arith.addf %23, %27 : vector<8x128xf32>
    %29 = vector.extract_strided_slice %3 {offsets = [0, 2], sizes = [4, 128], strides = [1, 1]} : vector<4x130xf32> to vector<4x128xf32>
    %c4 = arith.constant 4 : index
    %c0_17 = arith.constant 0 : index
    %c0_18 = arith.constant 0 : index
    %30 = vector.load %arg2[%c4, %c0_17, %c0_18] : memref<5x8x4xf32, #tpu.memory_space<vmem>>, vector<1x8x4xf32>
    %31 = vector.shape_cast %30 : vector<1x8x4xf32> to vector<8x4xf32>
    %cst_19 = arith.constant dense<0.000000e+00> : vector<8x128xf32>
    %32 = tpu.matmul %31, %29, %cst_19 {dimension_numbers = #tpu.dot_dimension_numbers<[1], [0], [0], [1], [0, 0, 1, 1], [], []>} : vector<8x4xf32>, vector<4x128xf32>, vector<8x128xf32> -> vector<8x128xf32>
    %33 = arith.addf %28, %32 : vector<8x128xf32>
    %c128_i32 = arith.constant 128 : i32
    %34 = arith.muli %c0_i32, %c128_i32 : i32
    %35 = tpu.assume_multiple %34, 128 : i32
    %c0_20 = arith.constant 0 : index
    %36 = arith.index_cast %35 : i32 to index
    %37 = vector.load %arg7[%c0_20, %36] : memref<8x256xf32, #tpu.memory_space<vmem>>, vector<8x128xf32>
    tpu.vector_store %arg7[%c0_20, %36], %33 {strides = array<i32>} : memref<8x256xf32, #tpu.memory_space<vmem>>, vector<8x128xf32>,
    %c1_i32 = arith.constant 1 : i32
    %c0_i32_21 = arith.constant 0 : i32
    %38 = arith.addi %c0_i32_21, %c1_i32 : i32
    %39 = arith.index_cast %38 : i32 to index
    %c0_22 = arith.constant 0 : index
    %c0_23 = arith.constant 0 : index
    %40 = vector.load %arg1[%39, %c0_22, %c0_23] : memref<4x4x130xf32, #tpu.memory_space<vmem>>, vector<1x4x130xf32>
    %41 = vector.shape_cast %40 : vector<1x4x130xf32> to vector<4x130xf32>
    %c2_i32_24 = arith.constant 2 : i32
    %42 = arith.addi %c2_i32_24, %c1_i32 : i32
    %43 = arith.index_cast %42 : i32 to index
    %c0_25 = arith.constant 0 : index
    %c0_26 = arith.constant 0 : index
    %44 = vector.load %arg1[%43, %c0_25, %c0_26] : memref<4x4x130xf32, #tpu.memory_space<vmem>>, vector<1x4x130xf32>
    %45 = vector.shape_cast %44 : vector<1x4x130xf32> to vector<4x130xf32>
    %cst_27 = arith.constant 0.000000e+00 : f32
    %46 = vector.broadcast %cst_27 : f32 to vector<8x128xf32>
    %47 = vector.extract_strided_slice %41 {offsets = [0, 0], sizes = [4, 128], strides = [1, 1]} : vector<4x130xf32> to vector<4x128xf32>
    %c0_28 = arith.constant 0 : index
    %c0_29 = arith.constant 0 : index
    %c0_30 = arith.constant 0 : index
    %48 = vector.load %arg2[%c0_28, %c0_29, %c0_30] : memref<5x8x4xf32, #tpu.memory_space<vmem>>, vector<1x8x4xf32>
    %49 = vector.shape_cast %48 : vector<1x8x4xf32> to vector<8x4xf32>
    %cst_31 = arith.constant dense<0.000000e+00> : vector<8x128xf32>
    %50 = tpu.matmul %49, %47, %cst_31 {dimension_numbers = #tpu.dot_dimension_numbers<[1], [0], [0], [1], [0, 0, 1, 1], [], []>} : vector<8x4xf32>, vector<4x128xf32>, vector<8x128xf32> -> vector<8x128xf32>
    %51 = arith.addf %46, %50 : vector<8x128xf32>
    %52 = vector.extract_strided_slice %45 {offsets = [0, 0], sizes = [4, 128], strides = [1, 1]} : vector<4x130xf32> to vector<4x128xf32>
    %c1_32 = arith.constant 1 : index
    %c0_33 = arith.constant 0 : index
    %c0_34 = arith.constant 0 : index
    %53 = vector.load %arg2[%c1_32, %c0_33, %c0_34] : memref<5x8x4xf32, #tpu.memory_space<vmem>>, vector<1x8x4xf32>
    %54 = vector.shape_cast %53 : vector<1x8x4xf32> to vector<8x4xf32>
    %cst_35 = arith.constant dense<0.000000e+00> : vector<8x128xf32>
    %55 = tpu.matmul %54, %52, %cst_35 {dimension_numbers = #tpu.dot_dimension_numbers<[1], [0], [0], [1], [0, 0, 1, 1], [], []>} : vector<8x4xf32>, vector<4x128xf32>, vector<8x128xf32> -> vector<8x128xf32>
    %56 = arith.addf %51, %55 : vector<8x128xf32>
    %57 = vector.extract_strided_slice %41 {offsets = [0, 1], sizes = [4, 128], strides = [1, 1]} : vector<4x130xf32> to vector<4x128xf32>
    %c2_36 = arith.constant 2 : index
    %c0_37 = arith.constant 0 : index
    %c0_38 = arith.constant 0 : index
    %58 = vector.load %arg2[%c2_36, %c0_37, %c0_38] : memref<5x8x4xf32, #tpu.memory_space<vmem>>, vector<1x8x4xf32>
    %59 = vector.shape_cast %58 : vector<1x8x4xf32> to vector<8x4xf32>
    %cst_39 = arith.constant dense<0.000000e+00> : vector<8x128xf32>
    %60 = tpu.matmul %59, %57, %cst_39 {dimension_numbers = #tpu.dot_dimension_numbers<[1], [0], [0], [1], [0, 0, 1, 1], [], []>} : vector<8x4xf32>, vector<4x128xf32>, vector<8x128xf32> -> vector<8x128xf32>
    %61 = arith.addf %56, %60 : vector<8x128xf32>
    %62 = vector.extract_strided_slice %45 {offsets = [0, 1], sizes = [4, 128], strides = [1, 1]} : vector<4x130xf32> to vector<4x128xf32>
    %c3_40 = arith.constant 3 : index
    %c0_41 = arith.constant 0 : index
    %c0_42 = arith.constant 0 : index
    %63 = vector.load %arg2[%c3_40, %c0_41, %c0_42] : memref<5x8x4xf32, #tpu.memory_space<vmem>>, vector<1x8x4xf32>
    %64 = vector.shape_cast %63 : vector<1x8x4xf32> to vector<8x4xf32>
    %cst_43 = arith.constant dense<0.000000e+00> : vector<8x128xf32>
    %65 = tpu.matmul %64, %62, %cst_43 {dimension_numbers = #tpu.dot_dimension_numbers<[1], [0], [0], [1], [0, 0, 1, 1], [], []>} : vector<8x4xf32>, vector<4x128xf32>, vector<8x128xf32> -> vector<8x128xf32>
    %66 = arith.addf %61, %65 : vector<8x128xf32>
    %67 = vector.extract_strided_slice %41 {offsets = [0, 2], sizes = [4, 128], strides = [1, 1]} : vector<4x130xf32> to vector<4x128xf32>
    %c4_44 = arith.constant 4 : index
    %c0_45 = arith.constant 0 : index
    %c0_46 = arith.constant 0 : index
    %68 = vector.load %arg2[%c4_44, %c0_45, %c0_46] : memref<5x8x4xf32, #tpu.memory_space<vmem>>, vector<1x8x4xf32>
    %69 = vector.shape_cast %68 : vector<1x8x4xf32> to vector<8x4xf32>
    %cst_47 = arith.constant dense<0.000000e+00> : vector<8x128xf32>
    %70 = tpu.matmul %69, %67, %cst_47 {dimension_numbers = #tpu.dot_dimension_numbers<[1], [0], [0], [1], [0, 0, 1, 1], [], []>} : vector<8x4xf32>, vector<4x128xf32>, vector<8x128xf32> -> vector<8x128xf32>
    %71 = arith.addf %66, %70 : vector<8x128xf32>
    %c128_i32_48 = arith.constant 128 : i32
    %72 = arith.muli %c1_i32, %c128_i32_48 : i32
    %73 = tpu.assume_multiple %72, 128 : i32
    %c0_49 = arith.constant 0 : index
    %74 = arith.index_cast %73 : i32 to index
    %75 = vector.load %arg7[%c0_49, %74] : memref<8x256xf32, #tpu.memory_space<vmem>>, vector<8x128xf32>
    tpu.vector_store %arg7[%c0_49, %74], %71 {strides = array<i32>} : memref<8x256xf32, #tpu.memory_space<vmem>>, vector<8x128xf32>,
    %c2_i32_50 = arith.constant 2 : i32
    %c0_51 = arith.constant 0 : index
    %c0_52 = arith.constant 0 : index
    %76 = vector.load %arg7[%c0_51, %c0_52] : memref<8x256xf32, #tpu.memory_space<vmem>>, vector<8x256xf32>
    %c0_53 = arith.constant 0 : index
    %c0_54 = arith.constant 0 : index
    %77 = vector.load %arg5[%c0_53, %c0_54] : memref<1x256xf32, #tpu.memory_space<vmem>>, vector<1x256xf32>
    %78 = vector.broadcast %77 : vector<1x256xf32> to vector<8x256xf32>
    %79 = arith.mulf %76, %78 : vector<8x256xf32>
    %cst_55 = arith.constant dense<0.000000e+00> : vector<8xf32>
    %80 = vector.multi_reduction <add>, %79, %cst_55 [1] : vector<8x256xf32> to vector<8xf32>
    %81 = vector.shape_cast %80 : vector<8xf32> to vector<8x1xf32>
    %cst_56 = arith.constant 6.250000e-02 : f32
    %82 = vector.broadcast %cst_56 : f32 to vector<8x1xf32>
    %83 = arith.mulf %81, %82 : vector<8x1xf32>
    %84 = vector.broadcast %83 : vector<8x1xf32> to vector<8x256xf32>
    %85 = arith.subf %76, %84 : vector<8x256xf32>
    %86 = vector.broadcast %77 : vector<1x256xf32> to vector<8x256xf32>
    %87 = arith.mulf %85, %86 : vector<8x256xf32>
    %88 = arith.mulf %87, %87 : vector<8x256xf32>
    %cst_57 = arith.constant dense<0.000000e+00> : vector<8xf32>
    %89 = vector.multi_reduction <add>, %88, %cst_57 [1] : vector<8x256xf32> to vector<8xf32>
    %90 = vector.shape_cast %89 : vector<8xf32> to vector<8x1xf32>
    %cst_58 = arith.constant 6.250000e-02 : f32
    %91 = vector.broadcast %cst_58 : f32 to vector<8x1xf32>
    %92 = arith.mulf %90, %91 : vector<8x1xf32>
    %c0_59 = arith.constant 0 : index
    %c0_60 = arith.constant 0 : index
    %93 = vector.load %arg3[%c0_59, %c0_60] : memref<8x1xf32, #tpu.memory_space<vmem>>, vector<8x1xf32>
    %cst_61 = arith.constant 9.99999974E-6 : f32
    %94 = vector.broadcast %cst_61 : f32 to vector<8x1xf32>
    %95 = arith.addf %92, %94 : vector<8x1xf32>
    %96 = math.rsqrt %95 : vector<8x1xf32>
    %97 = arith.mulf %93, %96 : vector<8x1xf32>
    %c0_62 = arith.constant 0 : index
    %c0_63 = arith.constant 0 : index
    %98 = vector.load %arg4[%c0_62, %c0_63] : memref<8x1xf32, #tpu.memory_space<vmem>>, vector<8x1xf32>
    %99 = arith.mulf %83, %97 : vector<8x1xf32>
    %100 = arith.subf %98, %99 : vector<8x1xf32>
    %101 = vector.broadcast %97 : vector<8x1xf32> to vector<8x256xf32>
    %102 = arith.mulf %76, %101 : vector<8x256xf32>
    %103 = vector.broadcast %100 : vector<8x1xf32> to vector<8x256xf32>
    %104 = arith.addf %102, %103 : vector<8x256xf32>
    %105 = arith.negf %104 : vector<8x256xf32>
    %106 = math.exp %105 : vector<8x256xf32>
    %cst_64 = arith.constant 1.000000e+00 : f32
    %107 = vector.broadcast %cst_64 : f32 to vector<8x256xf32>
    %108 = arith.addf %107, %106 : vector<8x256xf32>
    %109 = arith.divf %107, %108 : vector<8x256xf32>
    %c0_65 = arith.constant 0 : index
    %c0_66 = arith.constant 0 : index
    %110 = vector.load %arg6[%c0_65, %c0_66] : memref<8x256xf32, #tpu.memory_space<vmem>>, vector<8x256xf32>
    tpu.vector_store %arg6[%c0_65, %c0_66], %109 {strides = array<i32>} : memref<8x256xf32, #tpu.memory_space<vmem>>, vector<8x256xf32>,
    return
  }
  func.func @transform_0(%arg0: i32) -> (i32, i32, i32) {
    %c0_i32 = arith.constant 0 : i32
    %c0_i32_0 = arith.constant 0 : i32
    %c0_i32_1 = arith.constant 0 : i32
    %c0_i32_2 = arith.constant 0 : i32
    return %c0_i32, %c0_i32_0, %c0_i32_1 : i32, i32, i32
  }
  func.func @transform_1(%arg0: i32) -> (i32, i32, i32) {
    %c0_i32 = arith.constant 0 : i32
    %c0_i32_0 = arith.constant 0 : i32
    %c0_i32_1 = arith.constant 0 : i32
    return %c0_i32, %arg0, %c0_i32_0 : i32, i32, i32
  }
  func.func @transform_2(%arg0: i32) -> (i32, i32) {
    %c0_i32 = arith.constant 0 : i32
    %c0_i32_0 = arith.constant 0 : i32
    return %arg0, %c0_i32 : i32, i32
  }
  func.func @transform_3(%arg0: i32) -> (i32, i32) {
    %c0_i32 = arith.constant 0 : i32
    %c0_i32_0 = arith.constant 0 : i32
    return %arg0, %c0_i32 : i32, i32
  }
  func.func @transform_4(%arg0: i32) -> (i32, i32) {
    %c0_i32 = arith.constant 0 : i32
    %c0_i32_0 = arith.constant 0 : i32
    %c0_i32_1 = arith.constant 0 : i32
    return %c0_i32, %c0_i32_0 : i32, i32
  }
  func.func @transform_5(%arg0: i32) -> (i32, i32) {
    %c0_i32 = arith.constant 0 : i32
    %c0_i32_0 = arith.constant 0 : i32
    return %arg0, %c0_i32 : i32, i32
  }
}

</mosaic_0001>

<bundles_post_ra>
// kernel: tpu_custom_call.1
= control target key start
LH: loop header
LB: loop body
LE: loop exit
PB: predicated region body
PF: predicated region fallthrough
CT: control target
= control target key end

     0   :  { %s1069_s22 = smov 127   ;;  %v1070_v5 = vmov 0.0   ;;  %vm31_vm0 = vcmask 1043456   ;;  %vm27_vm1 = vcmask 31744   ;;  %vm1071_vm2 = vmmov 0   ;;  %s1208_s0 = inlined_call_operand.vmem [shape: f32[4,4,130], index: 0, kind: input, shape index: {}]   ;;  %s1209_s1 = inlined_call_operand.vmem [shape: f32[5,8,4], index: 1, kind: input, shape index: {}]   ;;  %s1210_s2 = inlined_call_operand.vmem [shape: f32[8,1], index: 2, kind: input, shape index: {}]   ;;  %s1211_s3 = inlined_call_operand.vmem [shape: f32[8,1], index: 3, kind: input, shape index: {}]   ;;  %s1212_s4 = inlined_call_operand.vmem [shape: f32[1,256], index: 4, kind: input, shape index: {}]   ;;  %s1213_s5 = inlined_call_operand.hbm [shape: f32[8,256], index: 5, kind: output, shape index: {}]  }
   0x1   :  { %v922_v0 = vld [vmem:[%s1208_s0 + $0x10] sm:$0xff]  ;;  %v21_v1 = vld [vmem:[%s1208_s0] sm:$0xff]  ;;  %v923_v4 = vld [vmem:[%s1209_s1 + $0x8] sm:$0xff]  ;;  %975 = vmatprep.subr.mxu0 %v1070_v5  ;;  %980 = vmatprep.subr.mxu1 %v1070_v5 }
   0x2   :  { %269 = vrot.lane.b32.xlu1 %v922_v0, %s1069_s22  ;;  %184 = vrot.lane.b32.xlu0 %v21_v1, %s1069_s22  ;;  %v268_v2 = vcombine.high %v922_v0, %v922_v0  ;;  %v183_v3 = vcombine.high %v21_v1, %v21_v1 }
   0x3   :  { %977 = vmatprep.mubr.msk.f32.mxu0 %vm1071_vm2, %v1070_v5  ;;  %976 = vmatpush3.msk.msra.mxu0 %vm31_vm0, %v922_v0 }
   0x4   :  { %10 = vsyncpa [#allocation4], 0  ;;  %981 = vmatpush3.msk.msra.mxu1 %vm31_vm0, %v21_v1  ;;  %978 = vmatmul.mubr.msk.f32.vlgmr.msra.gmra.mxu0 %vm27_vm1, %v923_v4  ;;  %v24_v6 = vld [vmem:[%s1209_s1] sm:$0xff]  ;;  %v937_v7 = vld [vmem:[%s1208_s0 + $0x8] sm:$0xff]  ;;  %s1072_s29 = smov 126   ;;  %vm188_vm3 = vcmask 1039360   ;;  %v847_v41 = vlaneseq }
   0x5   :  { %982 = vmatprep.mubr.msk.f32.mxu1 %vm1071_vm2, %v1070_v5  ;;  %985 = vmatprep.subr.mxu0 %v1070_v5  ;;  %v594_v8 = vcombine.high %v937_v7, %v937_v7  ;;  %v938_v9 = vld [vmem:[%s1208_s0 + $0x18] sm:$0xff]  ;;  %v928_v15 = vld [vmem:[%s1209_s1 + $0x10] sm:$0xff]  ;;  %vm356_vm4 = vcmask 1031168   ;;  %v934_v21 = vld [vmem:[%s1209_s1 + $0x20] sm:$0xff] }
   0x6   :  { %271 = vrot.lane.b32.xlu1 %v268_v2, %s1069_s22  ;;  %186 = vrot.lane.b32.xlu0 %v183_v3, %s1069_s22  ;;  %v677_v10 = vcombine.high %v938_v9, %v938_v9  ;;  %v931_v18 = vld [vmem:[%s1209_s1 + $0x18] sm:$0xff]  ;;  %v848_v47 = vshrl.u32 %v847_v41, 7  ;;  %v845_v58 = vld [vmem:[%s1212_s4] sm:$0x3] }
   0x7   :  { %990 = vmatprep.subr.mxu1 %v1070_v5  ;;  %983 = vmatmul.mubr.msk.f32.vlgmr.msra.gmra.mxu1 %vm27_vm1, %v24_v6 }
   0x8   :  { %987 = vmatprep.mubr.msk.f32.mxu0 %vm1071_vm2, %v1070_v5  ;;  %992 = vmatprep.mubr.msk.f32.mxu1 %vm1071_vm2, %v1070_v5  ;;  %v849_v55 = vsub.s32 0, %v848_v47  ;;  %v853_v56 = vsub.s32 1, %v848_v47 }
   0xa   :  { %354 = vrot.lane.b32.xlu1 %v183_v3, %s1072_s29  ;;  %352 = vrot.lane.b32.xlu0 %v21_v1, %s1072_s29  ;;  %v850_v62 = vrot.slane %v845_v58, %v849_v55  ;;  %v854_v63 = vrot.slane %v845_v58, %v853_v56 }
   0xe   :  { %597 = vrot.lane.b32.xlu1 %v594_v8, %s1069_s22  ;;  %595 = vrot.lane.b32.xlu0 %v937_v7, %s1069_s22 }
  0x12   :  { %680 = vrot.lane.b32.xlu1 %v677_v10, %s1069_s22  ;;  %678 = vrot.lane.b32.xlu0 %v938_v9, %s1069_s22 }
  0x16   :  { %762 = vrot.lane.b32.xlu1 %v594_v8, %s1072_s29  ;;  %760 = vrot.lane.b32.xlu0 %v937_v7, %s1072_s29 }
  0x74   :  { %v270_v11 = vpop.permute.xlu1 %269  ;;  %v185_v12 = vpop.permute.xlu0 %184 }
  0x78   :  { %v272_v13 = vpop.permute.xlu1 %271  ;;  %v187_v14 = vpop.permute.xlu0 %186 }
  0x79   :  { %v273_v16 = vsel %vm188_vm3, %v270_v11, %v272_v13  ;;  %v189_v17 = vsel %vm188_vm3, %v185_v12, %v187_v14 }
  0x7a   :  { %986 = vmatpush3.msk.msra.mxu0 %vm31_vm0, %v189_v17  ;;  %991 = vmatpush3.msk.msra.mxu1 %vm31_vm0, %v273_v16 }
  0x7b   :  { %988 = vmatmul.mubr.msk.f32.vlgmr.msra.gmra.mxu0 %vm27_vm1, %v928_v15  ;;  %995 = vmatprep.subr.mxu0 %v1070_v5 }
  0x7c   :  { %v355_v19 = vpop.permute.xlu1 %354  ;;  %v353_v20 = vpop.permute.xlu0 %352  ;;  %993 = vmatmul.mubr.msk.f32.vlgmr.msra.gmra.mxu1 %vm27_vm1, %v931_v18  ;;  %1000 = vmatprep.subr.mxu1 %v1070_v5 }
  0x7d   :  { %v357_v22 = vsel %vm356_vm4, %v353_v20, %v355_v19  ;;  %997 = vmatprep.mubr.msk.f32.mxu0 %vm1071_vm2, %v1070_v5  ;;  %1001 = vmatpush3.msk.msra.mxu1 %vm31_vm0, %v938_v9  ;;  %v873_v19 = vld [vmem:[%s1210_s2] sm:$0xff]  ;;  %s1074_s2 = smov [#allocation3]  }
  0x7e   :  { %996 = vmatpush3.msk.msra.mxu0 %vm31_vm0, %v357_v22  ;;  %1002 = vmatprep.mubr.msk.f32.mxu1 %vm1071_vm2, %v1070_v5  ;;  %v877_v22 = vld [vmem:[%s1211_s3] sm:$0xff]  ;;  %s914_s3 = sshll.u32 %s1074_s2, 4  ;;  %s915_s3 = int_to_ptr.vmem [resolvable:$true] %s914_s3 }
  0x7f   :  { %998 = vmatmul.mubr.msk.f32.vlgmr.msra.gmra.mxu0 %vm27_vm1, %v934_v21  ;;  %1010 = vmatprep.subr.mxu1 %v1070_v5  ;;  %s1047_s16 = scalar_lea.vmem %s915_s3, 256  ;;  %p1052_p1 = scmp.lt.s32.totalorder %s915_s3, %s915_s3 }
  0x80   :  { %v598_v23 = vpop.permute.xlu1 %597  ;;  %v596_v24 = vpop.permute.xlu0 %595  ;;  %1003 = vmatmul.mubr.msk.f32.vlgmr.msra.gmra.mxu1 %vm27_vm1, %v923_v4  ;;  %1005 = vmatprep.subr.mxu0 %v1070_v5  ;;  %p1048_p0 = scmp.ne.s32.totalorder %s915_s3, %s1047_s16  ;;  %p1053_p2 = scmp.lt.s32.totalorder %s1047_s16, %s1047_s16 }
  0x81   :  { %v599_v25 = vsel %vm188_vm3, %v596_v24, %v598_v23  ;;  %1006 = vmatpush3.msk.msra.mxu0 %vm31_vm0, %v937_v7  ;;  %1007 = vmatprep.mubr.msk.f32.mxu0 %vm1071_vm2, %v1070_v5 }
  0x82   :  { %1011 = vmatpush3.msk.msra.mxu1 %vm31_vm0, %v599_v25  ;;  %1015 = vmatprep.subr.mxu0 %v1070_v5  ;;  %p1054_p3 = por %p1053_p2, %p1052_p1 }
  0x83   :  { %1008 = vmatmul.mubr.msk.f32.vlgmr.msra.gmra.mxu0 %vm27_vm1, %v24_v6  ;;  %1012 = vmatprep.mubr.msk.f32.mxu1 %vm1071_vm2, %v1070_v5 }
  0x84   :  { %v681_v26 = vpop.permute.xlu1 %680  ;;  %v679_v27 = vpop.permute.xlu0 %678  ;;  %1013 = vmatmul.mubr.msk.f32.vlgmr.msra.gmra.mxu1 %vm27_vm1, %v928_v15  ;;  %1017 = vmatprep.mubr.msk.f32.mxu0 %vm1071_vm2, %v1070_v5  ;;  %v1073_v15 = vmov 0   ;;  %p1055_p4 = pnand %p1054_p3, %p1048_p0 }
  0x85   :  { %v682_v28 = vsel %vm188_vm3, %v679_v27, %v681_v26  ;;  %1020 = vmatprep.subr.mxu1 %v1070_v5  ;;  %1022 = vmatprep.mubr.msk.f32.mxu1 %vm1071_vm2, %v1070_v5 }
  0x86   :  { %1016 = vmatpush3.msk.msra.mxu0 %vm31_vm0, %v682_v28  ;;  %1031 = vset.pattern.permute.xlu0 %v1073_v15 }
  0x87   :  { %1018 = vmatmul.mubr.msk.f32.vlgmr.msra.gmra.mxu0 %vm27_vm1, %v931_v18  ;;  %1032 = vset.pattern.permute.xlu1 %v1073_v15 }
  0x88   :  { %v763_v29 = vpop.permute.xlu1 %762  ;;  %v761_v30 = vpop.permute.xlu0 %760 }
  0x89   :  { %v764_v31 = vsel %vm356_vm4, %v761_v30, %v763_v29 }
  0x8a   :  { %1021 = vmatpush3.msk.msra.mxu1 %vm31_vm0, %v764_v31 }
  0x8b   :  { %1023 = vmatmul.mubr.msk.f32.vlgmr.msra.gmra.mxu1 %vm27_vm1, %v934_v21 }
  0xc4   :  { %v101_v32 = vpop.f32.mrf.mxu0 }
  0xc6   :  { %v979_v33 = vpop.f32.mrf.mxu0 }
  0xc7   :  { %v177_v34 = vpop.f32.mrf.mxu1 }
  0xc8   :  { %v178_v35 = vadd.f32 %v177_v34, %v101_v32 }
  0xc9   :  { %v984_v36 = vpop.f32.mrf.mxu1 }
 0x13b   :  { %v261_v37 = vpop.f32.mrf.mxu0 }
 0x13c   :  { %v345_v38 = vpop.f32.mrf.mxu1  ;;  %v265_v45 = vadd.f32 %v261_v37, %v178_v35 }
 0x13d   :  { %v989_v39 = vpop.f32.mrf.mxu0 }
 0x13e   :  { %v994_v40 = vpop.f32.mrf.mxu1  ;;  %v349_v52 = vadd.f32 %v345_v38, %v265_v45 }
 0x13f   :  { %v429_v42 = vpop.f32.mrf.mxu0 }
 0x140   :  { %v513_v43 = vpop.f32.mrf.mxu1  ;;  %v433_v60 = vadd.f32 %v429_v42, %v349_v52 }
 0x141   :  { %v999_v44 = vpop.f32.mrf.mxu0 }
 0x142   :  { %v1004_v46 = vpop.f32.mrf.mxu1  ;;  %v857_v3 = vmul.f32 %v850_v62, %v433_v60 }
 0x143   :  { %v589_v48 = vpop.f32.mrf.mxu0 }
 0x144   :  { %v590_v49 = vadd.f32 %v589_v48, %v513_v43  ;;  %v671_v50 = vpop.f32.mrf.mxu1 }
 0x145   :  { %v1009_v51 = vpop.f32.mrf.mxu0 }
 0x146   :  { %v675_v53 = vadd.f32 %v671_v50, %v590_v49  ;;  %v1014_v54 = vpop.f32.mrf.mxu1 }
 0x147   :  { %v754_v57 = vpop.f32.mrf.mxu0 }
 0x148   :  { %v758_v61 = vadd.f32 %v754_v57, %v675_v53 }
 0x149   :  { %v1019_v59 = vpop.f32.mrf.mxu0 }
 0x14b   :  { %v836_v0 = vpop.f32.mrf.mxu1 }
 0x14c   :  { %v840_v1 = vadd.f32 %v836_v0, %v758_v61 }
 0x14d   :  { %v1024_v2 = vpop.f32.mrf.mxu1 }
 0x14e   :  { %v858_v4 = vmul.f32 %v854_v63, %v840_v1 }
 0x150   :  { %v859_v5 = vadd.f32 %v858_v4, %v857_v3 }
 0x152   :  { %860 = vadd.xlane.f32.xlu0 %v859_v5 }
 0x1db   :  { %v861_v6 = vpop.xlane.xlu0 %860 }
 0x1dc   :  { %v862_v7 = vmul.f32 0.0625, %v861_v6 }
 0x1de   :  { %v863_v8 = vsub.f32 %v433_v60, %v862_v7  ;;  %v864_v9 = vsub.f32 %v840_v1, %v862_v7 }
 0x1e0   :  { %v865_v10 = vmul.f32 %v863_v8, %v850_v62  ;;  %v866_v11 = vmul.f32 %v864_v9, %v854_v63 }
 0x1e2   :  { %v867_v12 = vmul.f32 %v865_v10, %v865_v10  ;;  %v868_v13 = vmul.f32 %v866_v11, %v866_v11 }
 0x1e4   :  { %v869_v14 = vadd.f32 %v868_v13, %v867_v12 }
 0x1e6   :  { %870 = vadd.xlane.f32.xlu1 %v869_v14 }
 0x26f   :  { %v871_v16 = vpop.xlane.xlu1 %870 }
 0x270   :  { %v872_v17 = vmul.f32 0.0625, %v871_v16 }
 0x272   :  { %v874_v18 = vadd.f32 1e-05, %v872_v17 }
 0x274   :  { %1037 = vrsqrt.f32 %v874_v18 }
 0x281   :  { %v1038_v20 = vpop.eup %1037 }
 0x282   :  { %v876_v21 = vmul.f32 %v1038_v20, %v873_v19 }
 0x284   :  { %882 = vperm.xlu0 %1031, %v876_v21   ;;  %v878_v23 = vmul.f32 %v876_v21, %v862_v7 }
 0x286   :  { %v879_v24 = vsub.f32 %v877_v22, %v878_v23 }
 0x288   :  { %889 = vperm.xlu1 %1032, %v879_v24  }
 0x2ff   :  { %v883_v25 = vpop.permute.xlu0 %882 }
 0x300   :  { %v885_v26 = vmul.f32 %v883_v25, %v433_v60  ;;  %v886_v27 = vmul.f32 %v883_v25, %v840_v1 }
 0x303   :  { %v890_v28 = vpop.permute.xlu1 %889 }
 0x304   :  { %v892_v29 = vadd.f32 %v890_v28, %v885_v26  ;;  %v893_v30 = vadd.f32 %v890_v28, %v886_v27 }
 0x306   :  { %v953_v31 = vmul.f32 -1.442695, %v892_v29  ;;  %v954_v32 = vmul.f32 -1.442695, %v893_v30 }
 0x308   :  { %1039 = vpow2.f32 %v953_v31 }
 0x309   :  { %1041 = vpow2.f32 %v954_v32 }
 0x315   :  { %v1040_v33 = vpop.eup %1039 }
 0x316   :  { %v1042_v34 = vpop.eup %1041  ;;  %v900_v35 = vadd.f32 1.0, %v1040_v33 }
 0x317   :  { %v901_v36 = vadd.f32 1.0, %v1042_v34 }
 0x318   :  { %1043 = vrcp.f32 %v900_v35 }
 0x319   :  { %1045 = vrcp.f32 %v901_v36 }
 0x325   :  { %v1044_v37 = vpop.eup %1043 }
 0x326   :  { %v1046_v38 = vpop.eup %1045  ;;  %906 = vst [vmem:[#allocation3] sm:$0xff] %v1044_v37 }
 0x327   :  { %907 = vst [vmem:[#allocation3 + $0x8] sm:$0xff] %v1046_v38 }
 0x328   :  { %1058 = shalt.err (!%p1055_p4)
}
 0x329   :  { %917 = dma.vmem_to_hbm [thread:$0]  %s915_s3, 256, %s1213_s5, [#allocation4]  }
 0x32a   :  { %1067 = dma.done.wait [#allocation4], 256  }
 0x32b   :  { %1068 = vsyncadd [#allocation4], 4294967040 }
 0x32c   :  { %921 = vsyncpa [#allocation4], 1 }

</bundles_post_ra>
